<compile_context>
chip_gen: v5e
topology: v5e:2x2
jax: 0.10.0
libtpu: 0.0.40
codegen_flags: <defaults>
</compile_context>

<pallas_src>
import functools
import math

import jax
import jax.numpy as jnp
from jax.experimental import pallas as pl
from jax.experimental.pallas import tpu as pltpu

# ----------------------------------------------------------------------------
# Compiler params helper
# ----------------------------------------------------------------------------

_VMEM_LIMIT = 32 * 1024 * 1024  # safe on v5e/v6e/v7x, raises v5e's 16 MiB default


def _cparams(n_parallel):
    return pltpu.CompilerParams(
        dimension_semantics=("parallel",) * n_parallel,
        vmem_limit_bytes=_VMEM_LIMIT,
    )


def _row_tile(n, cap=512):
    # block row-dim must be divisible by 8 OR equal the full dim
    return n if n <= cap else cap


# ----------------------------------------------------------------------------
# Linear (x @ W + b), row-tiled, bf16 MXU inputs, f32 accumulation
# ----------------------------------------------------------------------------


def _linear_kernel(x_ref, w_ref, b_ref, o_ref):
    o_ref[...] = (
        jnp.dot(x_ref[...].astype(jnp.bfloat16), w_ref[...],
                preferred_element_type=jnp.float32)
        + b_ref[...]
    )


def pallas_linear(x, w_t, b):
    """y = x @ w_t + b, w_t: (Din, Dout) bf16 (pre-transposed), b: (1, Dout) f32."""
    shape = x.shape
    din, dout = w_t.shape
    x2 = x.reshape(-1, din)
    n = x2.shape[0]
    tm = _row_tile(n)
    out = pl.pallas_call(
        _linear_kernel,
        out_shape=jax.ShapeDtypeStruct((n, dout), jnp.float32),
        grid=(pl.cdiv(n, tm),),
        in_specs=[
            pl.BlockSpec((tm, din), lambda i: (i, 0)),
            pl.BlockSpec((din, dout), lambda i: (0, 0)),   # weight resident
            pl.BlockSpec((1, dout), lambda i: (0, 0)),
        ],
        out_specs=pl.BlockSpec((tm, dout), lambda i: (i, 0)),
        compiler_params=_cparams(1),
    )(x2, w_t, b)
    return out.reshape(shape[:-1] + (dout,))


# ----------------------------------------------------------------------------
# LayerNorm helpers
# ----------------------------------------------------------------------------


def _ln_body(x, g, b, eps):
    mu = jnp.mean(x, axis=-1, keepdims=True)
    xc = x - mu
    var = jnp.mean(xc * xc, axis=-1, keepdims=True)
    return xc * jax.lax.rsqrt(var + eps) * g + b


def _ln_kernel(x_ref, g_ref, b_ref, o_ref, *, eps):
    o_ref[...] = _ln_body(x_ref[...], g_ref[...], b_ref[...], eps)


def pallas_layernorm(x, g, b, eps=1e-5):
    shape = x.shape
    d = shape[-1]
    x2 = x.reshape(-1, d)
    n = x2.shape[0]
    tm = _row_tile(n, cap=1024)
    out = pl.pallas_call(
        functools.partial(_ln_kernel, eps=eps),
        out_shape=jax.ShapeDtypeStruct((n, d), jnp.float32),
        grid=(pl.cdiv(n, tm),),
        in_specs=[
            pl.BlockSpec((tm, d), lambda i: (i, 0)),
            pl.BlockSpec((1, d), lambda i: (0, 0)),
            pl.BlockSpec((1, d), lambda i: (0, 0)),
        ],
        out_specs=pl.BlockSpec((tm, d), lambda i: (i, 0)),
        compiler_params=_cparams(1),
    )(x2, g, b)
    return out.reshape(shape)


# ----------------------------------------------------------------------------
# Fused multi-head attention helper (runs on VMEM tiles inside a kernel):
# scores -> additive mask -> stable softmax (EUP reciprocal) -> @V -> concat.
# ----------------------------------------------------------------------------


def _mha_core(q, k, v, mask_add, n_heads):
    D = q.shape[-1]
    dh = D // n_heads
    q_bf = q.astype(jnp.bfloat16)
    k_bf = k.astype(jnp.bfloat16)
    v_bf = v.astype(jnp.bfloat16)
    heads = []
    for h in range(n_heads):                      # static, unrolled head loop
        lo, hi = h * dh, (h + 1) * dh
        s = jax.lax.dot_general(
            q_bf[:, lo:hi], k_bf[:, lo:hi],
            (((1,), (1,)), ((), ())),
            preferred_element_type=jnp.float32)   # (Lq, Lk)
        s = s + mask_add
        s = s - jnp.max(s, axis=-1, keepdims=True)
        p = jnp.exp(s)
        denom = jnp.sum(p, axis=-1, keepdims=True)
        p = p * pl.reciprocal(denom, approx=True)  # divide on the EUP
        heads.append(jax.lax.dot_general(
            p.astype(jnp.bfloat16), v_bf[:, lo:hi],
            (((1,), (0,)), ((), ())),
            preferred_element_type=jnp.float32))   # (Lq, dh)
    return jnp.concatenate(heads, axis=-1)         # (Lq, D), lane-dense


# ----------------------------------------------------------------------------
# Fused self-attention block:  LN(x + OutProj(MHSA(QKV(x))))
# grid over batch; padding mask (and optional block-diagonal chunk tgt_mask)
# built in-kernel from scalar-prefetched per-batch key lengths.
# ----------------------------------------------------------------------------


def _self_attn_block_kernel(kv_len_ref, x_ref, wqkv_ref, bqkv_ref,
                            wo_ref, bo_ref, g_ref, beta_ref, o_ref, *,
                            n_heads, scale, chunk_n_spk, eps):
    b = pl.program_id(0)
    x = x_ref[0]                                   # (L, D) f32
    L, D = x.shape

    # fused QKV projection (one MXU matmul)
    qkv = (jnp.dot(x.astype(jnp.bfloat16), wqkv_ref[...],
                   preferred_element_type=jnp.float32)
           + bqkv_ref[...])                        # (L, 3D)
    q = qkv[:, :D] * scale
    k = qkv[:, D:2 * D]
    v = qkv[:, 2 * D:]

    # additive mask built in-kernel (no (BH, L, L) HBM mask traffic)
    kv_len = kv_len_ref[b]
    k_pos = jax.lax.broadcasted_iota(jnp.int32, (L, L), 1)
    valid = k_pos < kv_len
    if chunk_n_spk is not None:                    # block-diagonal tgt_mask
        q_pos = jax.lax.broadcasted_iota(jnp.int32, (L, L), 0)
        valid = jnp.logical_and(
            valid, (q_pos // chunk_n_spk) == (k_pos // chunk_n_spk))
    mask_add = jnp.where(valid, 0.0, -1e9).astype(jnp.float32)

    attn = _mha_core(q, k, v, mask_add, n_heads)   # (L, D)

    # output projection + residual + LayerNorm, all in VMEM
    proj = (jnp.dot(attn.astype(jnp.bfloat16), wo_ref[...],
                    preferred_element_type=jnp.float32)
            + bo_ref[...])
    o_ref[0] = _ln_body(x + proj, g_ref[...], beta_ref[...], eps)


def pallas_self_attn_block(x, p, norm, n_heads, kv_len, chunk_n_spk=None,
                           eps=1e-5):
    """x: (B, L, D) f32; kv_len: (B,) int32 valid key length per batch."""
    B, L, D = x.shape
    g, beta = norm
    scale = 1.0 / math.sqrt(D // n_heads)
    kernel = functools.partial(_self_attn_block_kernel, n_heads=n_heads,
                               scale=scale, chunk_n_spk=chunk_n_spk, eps=eps)
    grid_spec = pltpu.PrefetchScalarGridSpec(
        num_scalar_prefetch=1,
        grid=(B,),
        in_specs=[
            pl.BlockSpec((1, L, D), lambda b, kl: (b, 0, 0)),
            pl.BlockSpec((D, 3 * D), lambda b, kl: (0, 0)),   # weights resident
            pl.BlockSpec((1, 3 * D), lambda b, kl: (0, 0)),
            pl.BlockSpec((D, D), lambda b, kl: (0, 0)),
            pl.BlockSpec((1, D), lambda b, kl: (0, 0)),
            pl.BlockSpec((1, D), lambda b, kl: (0, 0)),
            pl.BlockSpec((1, D), lambda b, kl: (0, 0)),
        ],
        out_specs=pl.BlockSpec((1, L, D), lambda b, kl: (b, 0, 0)),
    )
    return pl.pallas_call(
        kernel,
        out_shape=jax.ShapeDtypeStruct((B, L, D), jnp.float32),
        grid_spec=grid_spec,
        compiler_params=_cparams(1),
    )(kv_len.astype(jnp.int32), x, p["in_w_t"], p["in_b"],
      p["out_w_t"], p["out_b"], g, beta)


# ----------------------------------------------------------------------------
# Fused cross-attention block:  LN(tgt + OutProj(MHA(Q(tgt), KV(memory))))
# ----------------------------------------------------------------------------


def _cross_attn_block_kernel(kv_len_ref, t_ref, m_ref, wq_ref, bq_ref,
                             wkv_ref, bkv_ref, wo_ref, bo_ref, g_ref, beta_ref,
                             o_ref, *, n_heads, scale, eps):
    b = pl.program_id(0)
    x = t_ref[0]                                   # (Lq, D)
    mem = m_ref[0]                                 # (Lk, D)
    Lq, D = x.shape
    Lk = mem.shape[0]

    q = (jnp.dot(x.astype(jnp.bfloat16), wq_ref[...],
                 preferred_element_type=jnp.float32) + bq_ref[...]) * scale
    kv = (jnp.dot(mem.astype(jnp.bfloat16), wkv_ref[...],
                  preferred_element_type=jnp.float32) + bkv_ref[...])
    k = kv[:, :D]
    v = kv[:, D:]

    kv_len = kv_len_ref[b]
    k_pos = jax.lax.broadcasted_iota(jnp.int32, (Lq, Lk), 1)
    mask_add = jnp.where(k_pos < kv_len, 0.0, -1e9).astype(jnp.float32)

    attn = _mha_core(q, k, v, mask_add, n_heads)   # (Lq, D)

    proj = (jnp.dot(attn.astype(jnp.bfloat16), wo_ref[...],
                    preferred_element_type=jnp.float32)
            + bo_ref[...])
    o_ref[0] = _ln_body(x + proj, g_ref[...], beta_ref[...], eps)


def pallas_cross_attn_block(tgt, memory, p, norm, n_heads, kv_len, eps=1e-5):
    B, Lq, D = tgt.shape
    Lk = memory.shape[1]
    g, beta = norm
    scale = 1.0 / math.sqrt(D // n_heads)
    kernel = functools.partial(_cross_attn_block_kernel, n_heads=n_heads,
                               scale=scale, eps=eps)
    grid_spec = pltpu.PrefetchScalarGridSpec(
        num_scalar_prefetch=1,
        grid=(B,),
        in_specs=[
            pl.BlockSpec((1, Lq, D), lambda b, kl: (b, 0, 0)),
            pl.BlockSpec((1, Lk, D), lambda b, kl: (b, 0, 0)),
            pl.BlockSpec((D, D), lambda b, kl: (0, 0)),
            pl.BlockSpec((1, D), lambda b, kl: (0, 0)),
            pl.BlockSpec((D, 2 * D), lambda b, kl: (0, 0)),
            pl.BlockSpec((1, 2 * D), lambda b, kl: (0, 0)),
            pl.BlockSpec((D, D), lambda b, kl: (0, 0)),
            pl.BlockSpec((1, D), lambda b, kl: (0, 0)),
            pl.BlockSpec((1, D), lambda b, kl: (0, 0)),
            pl.BlockSpec((1, D), lambda b, kl: (0, 0)),
        ],
        out_specs=pl.BlockSpec((1, Lq, D), lambda b, kl: (b, 0, 0)),
    )
    return pl.pallas_call(
        kernel,
        out_shape=jax.ShapeDtypeStruct((B, Lq, D), jnp.float32),
        grid_spec=grid_spec,
        compiler_params=_cparams(1),
    )(kv_len.astype(jnp.int32), tgt, memory, p["q_w_t"], p["q_b"],
      p["kv_w_t"], p["kv_b"], p["out_w_t"], p["out_b"], g, beta)


# ----------------------------------------------------------------------------
# Fused feed-forward block:  LN(x + W2 relu(W1 x + b1) + b2), row-tiled
# ----------------------------------------------------------------------------


def _ffn_block_kernel(x_ref, w1_ref, b1_ref, w2_ref, b2_ref, g_ref, beta_ref,
                      o_ref, *, eps):
    x = x_ref[...]
    h = (jnp.dot(x.astype(jnp.bfloat16), w1_ref[...],
                 preferred_element_type=jnp.float32) + b1_ref[...])
    h = jnp.maximum(h, 0.0)
    f = (jnp.dot(h.astype(jnp.bfloat16), w2_ref[...],
                 preferred_element_type=jnp.float32) + b2_ref[...])
    o_ref[...] = _ln_body(x + f, g_ref[...], beta_ref[...], eps)


def pallas_ffn_block(x, p, norm, eps=1e-5):
    shape = x.shape
    d = shape[-1]
    dff = p["w1_t"].shape[1]
    g, beta = norm
    x2 = x.reshape(-1, d)
    n = x2.shape[0]
    tm = _row_tile(n)
    out = pl.pallas_call(
        functools.partial(_ffn_block_kernel, eps=eps),
        out_shape=jax.ShapeDtypeStruct((n, d), jnp.float32),
        grid=(pl.cdiv(n, tm),),
        in_specs=[
            pl.BlockSpec((tm, d), lambda i: (i, 0)),
            pl.BlockSpec((d, dff), lambda i: (0, 0)),
            pl.BlockSpec((1, dff), lambda i: (0, 0)),
            pl.BlockSpec((dff, d), lambda i: (0, 0)),
            pl.BlockSpec((1, d), lambda i: (0, 0)),
            pl.BlockSpec((1, d), lambda i: (0, 0)),
            pl.BlockSpec((1, d), lambda i: (0, 0)),
        ],
        out_specs=pl.BlockSpec((tm, d), lambda i: (i, 0)),
        compiler_params=_cparams(1),
    )(x2, p["w1_t"], p["b1"], p["w2_t"], p["b2"], g, beta)
    return out.reshape(shape)


# ----------------------------------------------------------------------------
# sigmoid(enc @ attractors^T) — computed transposed so the in-kernel store is
# lane-dense (time on lanes instead of n_speakers≈3), transposed back once.
# ----------------------------------------------------------------------------


def _bmm_sig_kernel(a_ref, e_ref, o_ref):
    a = a_ref[0].astype(jnp.bfloat16)   # (S, D)
    e = e_ref[0].astype(jnp.bfloat16)   # (T, D)
    s = jax.lax.dot_general(a, e, (((1,), (1,)), ((), ())),
                            preferred_element_type=jnp.float32)  # (S, T)
    o_ref[0] = jax.nn.sigmoid(s)


def pallas_bmm_sigmoid(enc, att):
    """sigmoid(enc @ att^T) -> (NB, T, S), batched over the leading dim."""
    NB, T, D = enc.shape
    S = att.shape[1]
    out_st = pl.pallas_call(
        _bmm_sig_kernel,
        out_shape=jax.ShapeDtypeStruct((NB, S, T), jnp.float32),
        grid=(NB,),
        in_specs=[
            pl.BlockSpec((1, S, D), lambda b: (b, 0, 0)),
            pl.BlockSpec((1, T, D), lambda b: (b, 0, 0)),
        ],
        out_specs=pl.BlockSpec((1, S, T), lambda b: (b, 0, 0)),
        compiler_params=_cparams(1),
    )(att, enc)
    return jnp.swapaxes(out_st, 1, 2)


# ----------------------------------------------------------------------------
# Transformer layers (2 pallas_calls / encoder layer, 3 / decoder layer)
# ----------------------------------------------------------------------------


def transformer_encoder_layer(src, p, n_heads, seq_lens):
    # post-norm (PyTorch default), ReLU activation, eval mode (no dropout)
    src = pallas_self_attn_block(src, p["self_attn"], p["norm1"],
                                 n_heads, seq_lens)
    src = pallas_ffn_block(src, p["ffn"], p["norm2"])
    return src


def transformer_decoder_layer(tgt, memory, p, n_heads, n_speakers, mem_kv_len):
    B, L, _ = tgt.shape
    full = jnp.full((B,), L, jnp.int32)
    tgt = pallas_self_attn_block(tgt, p["self_attn"], p["norm1"], n_heads,
                                 full, chunk_n_spk=n_speakers)  # block-diag tgt_mask
    tgt = pallas_cross_attn_block(tgt, memory, p["cross_attn"], p["norm2"],
                                  n_heads, mem_kv_len)
    tgt = pallas_ffn_block(tgt, p["ffn"], p["norm3"])
    return tgt


# ----------------------------------------------------------------------------
# EDA attractor extractor (LSTM encoder/decoder).
# TODO(synk): eda_spk_extractor source not provided; canonical EEND-EDA LSTM
# encoder/decoder attractor semantics assumed; serial lax.scan kept in JAX.
# ----------------------------------------------------------------------------


def _lstm_scan(x, h0, c0, p):
    """x: (B, L, D) -> per-step (hs, cs): (L, B, D). torch gate order i,f,g,o."""
    w_ih_t = jnp.transpose(p["w_ih"])
    w_hh_t = jnp.transpose(p["w_hh"])

    def step(carry, xt):
        h, c = carry
        gates = xt @ w_ih_t + p["b_ih"] + h @ w_hh_t + p["b_hh"]
        i, f, g, o = jnp.split(gates, 4, axis=-1)
        i, f, o = jax.nn.sigmoid(i), jax.nn.sigmoid(f), jax.nn.sigmoid(o)
        g = jnp.tanh(g)
        c = f * c + i * g
        h = o * jnp.tanh(c)
        return (h, c), (h, c)

    _, (hs, cs) = jax.lax.scan(step, (h0, c0), jnp.swapaxes(x, 0, 1))
    return hs, cs


def eda_spk_extractor_forward(enc, seq_lens, p, n_speakers):
    B, T, D = enc.shape
    h0 = jnp.zeros((B, D), jnp.float32)
    c0 = jnp.zeros((B, D), jnp.float32)
    hs, cs = _lstm_scan(enc, h0, c0, p["enc_lstm"])  # (T, B, D)
    idx = jnp.clip(seq_lens - 1, 0, T - 1)
    bidx = jnp.arange(B)
    hT, cT = hs[idx, bidx], cs[idx, bidx]
    dec_in = jnp.zeros((B, n_speakers, D), jnp.float32)
    hs_d, _ = _lstm_scan(dec_in, hT, cT, p["dec_lstm"])
    attractors = jnp.swapaxes(hs_d, 0, 1)  # (B, n_spk, D)
    logits = pallas_linear(attractors, p["counter"]["w_t"], p["counter"]["b"])
    act_prob = jax.nn.sigmoid(logits)[..., 0]  # (B, n_spk)
    return attractors, act_prob


# ----------------------------------------------------------------------------
# EDA_RC forward (inference path: label=None, has_mask=False, eval mode)
# ----------------------------------------------------------------------------


def eda_rc_forward(params, src, seq_lens, *, n_heads, n_speakers, chunk_size):
    B, T, _ = src.shape
    seq_lens = seq_lens.astype(jnp.int32)

    # encoder Linear + LayerNorm (Pallas)
    x = pallas_linear(src.astype(jnp.float32), params["enc"]["w_t"],
                      params["enc"]["b"])
    x = pallas_layernorm(x, *params["enc_norm"])

    # transformer encoder, (B, T, D) layout throughout
    for lp in params["enc_layers"]:
        x = transformer_encoder_layer(x, lp, n_heads, seq_lens)
    enc_output = x  # (B, T, D)

    # chunking: chunk-major stacking, as torch.cat(torch.split(...), dim=0)
    padded_len = (chunk_size - T % chunk_size) % chunk_size
    n_chunk = (T + padded_len) // chunk_size
    enc_padded = jnp.pad(enc_output, ((0, 0), (0, padded_len), (0, 0)))
    enc_stacked = (enc_padded.reshape(B, n_chunk, chunk_size, -1)
                   .transpose(1, 0, 2, 3)
                   .reshape(n_chunk * B, chunk_size, -1))
    chunk_start = jnp.arange(n_chunk, dtype=jnp.int32)[:, None] * chunk_size
    seq_len_stacked = jnp.clip(seq_lens[None, :] - chunk_start,
                               0, chunk_size).reshape(-1)

    # EDA attractors + existence probabilities per chunk
    att_stacked, act_prob_stacked = eda_spk_extractor_forward(
        enc_stacked, seq_len_stacked, params["eda"], n_speakers)

    # per-frame speaker activity: sigmoid(enc @ attractors^T)  (Pallas bmm)
    output_stacked = pallas_bmm_sigmoid(enc_stacked, att_stacked)

    # speaker embeddings refined by a 1-layer TransformerDecoder
    spk_emb = (att_stacked.reshape(n_chunk, B, n_speakers, -1)
               .transpose(1, 0, 2, 3))                  # (B, n_chunk, S, D)
    L = n_chunk * n_speakers
    tgt = spk_emb.reshape(B, L, -1)
    tgt = transformer_decoder_layer(tgt, enc_output, params["dec_layer"],
                                    n_heads, n_speakers, seq_lens)
    spk_emb_out = tgt.reshape(B, n_chunk, n_speakers, -1)

    # TODO(synk): RNN_Clusterer.decode_beam_search source not provided; the
    # data-dependent per-chunk speaker re-ordering is skipped — chunks are
    # concatenated in identity speaker order.
    output = (output_stacked.reshape(n_chunk, B, chunk_size, n_speakers)
              .transpose(1, 0, 2, 3)
              .reshape(B, n_chunk * chunk_size, n_speakers))[:, :T]
    stat_outputs = {}
    return output, stat_outputs, act_prob_stacked, spk_emb_out


# ----------------------------------------------------------------------------
# Deterministic parameter initialization (torch-style shapes) + one-time prep
# (transpose to (Din, Dout) and cast matmul weights to bf16).
# ----------------------------------------------------------------------------


def init_params(key, in_size, n_units, n_layers, dim_ff, n_speakers):
    holder = [key]

    def nxt():
        holder[0], sub = jax.random.split(holder[0])
        return sub

    def uni(shape, a=0.1):
        return jax.random.uniform(nxt(), shape, jnp.float32, minval=-a, maxval=a)

    def attn_params(d):
        return dict(in_proj_w=uni((3 * d, d)),
                    in_proj_b=jnp.zeros((3 * d,), jnp.float32),
                    out_w=uni((d, d)), out_b=jnp.zeros((d,), jnp.float32))

    def lstm_params(d):
        return dict(w_ih=uni((4 * d, d)), w_hh=uni((4 * d, d)),
                    b_ih=jnp.zeros((4 * d,), jnp.float32),
                    b_hh=jnp.zeros((4 * d,), jnp.float32))

    ones = lambda n: jnp.ones((n,), jnp.float32)
    zeros = lambda n: jnp.zeros((n,), jnp.float32)

    return dict(
        enc_w=uni((n_units, in_size)),        # init_weights: uniform(-0.1, 0.1)
        enc_b=zeros(n_units),                 # init_weights: zero bias
        enc_norm_g=ones(n_units), enc_norm_b=zeros(n_units),
        enc_layers=[
            dict(self_attn=attn_params(n_units),
                 lin1_w=uni((dim_ff, n_units)), lin1_b=zeros(dim_ff),
                 lin2_w=uni((n_units, dim_ff)), lin2_b=zeros(n_units),
                 norm1_g=ones(n_units), norm1_b=zeros(n_units),
                 norm2_g=ones(n_units), norm2_b=zeros(n_units))
            for _ in range(n_layers)
        ],
        eda=dict(enc_lstm=lstm_params(n_units), dec_lstm=lstm_params(n_units),
                 counter_w=uni((1, n_units)), counter_b=zeros(1)),
        dec_layer=dict(self_attn=attn_params(n_units),
                       cross_attn=attn_params(n_units),
                       lin1_w=uni((dim_ff, n_units)), lin1_b=zeros(dim_ff),
                       lin2_w=uni((n_units, dim_ff)), lin2_b=zeros(n_units),
                       norm1_g=ones(n_units), norm1_b=zeros(n_units),
                       norm2_g=ones(n_units), norm2_b=zeros(n_units),
                       norm3_g=ones(n_units), norm3_b=zeros(n_units)),
    )


def prepare_params(raw):
    """One-time weight transpose + bf16 cast (no per-call transposes/casts)."""
    f32, bf16 = jnp.float32, jnp.bfloat16

    def lin(w, b):
        return dict(w_t=jnp.transpose(w).astype(bf16),
                    b=b.reshape(1, -1).astype(f32))

    def norm(g, b):
        return (g.reshape(1, -1).astype(f32), b.reshape(1, -1).astype(f32))

    def attn(a, cross=False):
        D = a["out_w"].shape[0]
        w_t = jnp.transpose(a["in_proj_w"]).astype(bf16)   # (D, 3D)
        b = a["in_proj_b"].astype(f32)
        out = dict(in_w_t=w_t, in_b=b.reshape(1, -1),
                   out_w_t=jnp.transpose(a["out_w"]).astype(bf16),
                   out_b=a["out_b"].reshape(1, -1).astype(f32))
        if cross:
            out.update(q_w_t=w_t[:, :D], q_b=b[:D].reshape(1, -1),
                       kv_w_t=w_t[:, D:], kv_b=b[D:].reshape(1, -1))
        return out

    def ffn(lp):
        return dict(w1_t=jnp.transpose(lp["lin1_w"]).astype(bf16),
                    b1=lp["lin1_b"].reshape(1, -1).astype(f32),
                    w2_t=jnp.transpose(lp["lin2_w"]).astype(bf16),
                    b2=lp["lin2_b"].reshape(1, -1).astype(f32))

    dl = raw["dec_layer"]
    return dict(
        enc=lin(raw["enc_w"], raw["enc_b"]),
        enc_norm=norm(raw["enc_norm_g"], raw["enc_norm_b"]),
        enc_layers=[
            dict(self_attn=attn(lp["self_attn"]),
                 ffn=ffn(lp),
                 norm1=norm(lp["norm1_g"], lp["norm1_b"]),
                 norm2=norm(lp["norm2_g"], lp["norm2_b"]))
            for lp in raw["enc_layers"]
        ],
        eda=dict(enc_lstm=raw["eda"]["enc_lstm"],
                 dec_lstm=raw["eda"]["dec_lstm"],
                 counter=lin(raw["eda"]["counter_w"], raw["eda"]["counter_b"])),
        dec_layer=dict(self_attn=attn(dl["self_attn"]),
                       cross_attn=attn(dl["cross_attn"], cross=True),
                       ffn=ffn(dl),
                       norm1=norm(dl["norm1_g"], dl["norm1_b"]),
                       norm2=norm(dl["norm2_g"], dl["norm2_b"]),
                       norm3=norm(dl["norm3_g"], dl["norm3_b"])),
    )


# ----------------------------------------------------------------------------


if __name__ == "__main__":
    key = jax.random.PRNGKey(0)
    k_src, k_par = jax.random.split(key)

    # small, shape-consistent configuration
    B, T, in_size = 2, 8, 16
    n_speakers, n_heads, n_units, n_layers, dim_ff = 3, 4, 32, 2, 64
    chunk_size = 4  # -> 2 chunks of the T=8 sequence

    src = jax.random.normal(k_src, (B, T, in_size), jnp.float32)
    seq_lens = jnp.array([8, 6], jnp.int32)
    raw_params = init_params(k_par, in_size, n_units, n_layers, dim_ff,
                             n_speakers)
    params = prepare_params(raw_params)

    output, stat_outputs, act_prob, spk_emb = eda_rc_forward(
        params, src, seq_lens,
        n_heads=n_heads, n_speakers=n_speakers, chunk_size=chunk_size)

    jax.tree_util.tree_map(lambda a: a.block_until_ready(),
                           (output, act_prob, spk_emb))

    assert output.shape == (B, T, n_speakers)
    assert act_prob.shape == (2 * B, n_speakers)           # n_chunk*B
    assert spk_emb.shape == (B, 2, n_speakers, n_units)    # (B, n_chunk, S, D)
    print("KERNEL_OK")
</pallas_src>

<mosaic_0001>
module attributes {stable_mosaic.version = 11 : i64} {
  func.func @_linear_kernel(%arg0: i32, %arg1: memref<16x16xf32, #tpu.memory_space<vmem>>, %arg2: memref<16x32xbf16, #tpu.memory_space<vmem>>, %arg3: memref<1x32xf32, #tpu.memory_space<vmem>>, %arg4: memref<16x32xf32, #tpu.memory_space<vmem>>) attributes {dimension_semantics = [#tpu.dimension_semantics<parallel>], iteration_bounds = array<i64: 1>, scalar_prefetch = 0 : i64, scratch_operands = 0 : i64, tpu.core_type = #tpu.core_type<tc>, window_params = [{transform_indices = @transform_0, window_bounds = array<i64: 16, 16>}, {pipeline_mode = #tpu.pipeline_mode<synchronous>, transform_indices = @transform_1, window_bounds = array<i64: 16, 32>}, {pipeline_mode = #tpu.pipeline_mode<synchronous>, transform_indices = @transform_2, window_bounds = array<i64: 1, 32>}, {transform_indices = @transform_3, window_bounds = array<i64: 16, 32>}]} {
    %c0 = arith.constant 0 : index
    %c0_0 = arith.constant 0 : index
    %0 = vector.load %arg1[%c0, %c0_0] : memref<16x16xf32, #tpu.memory_space<vmem>>, vector<16x16xf32>
    %1 = arith.truncf %0 : vector<16x16xf32> to vector<16x16xbf16>
    %c0_1 = arith.constant 0 : index
    %c0_2 = arith.constant 0 : index
    %2 = vector.load %arg2[%c0_1, %c0_2] : memref<16x32xbf16, #tpu.memory_space<vmem>>, vector<16x32xbf16>
    %cst = arith.constant dense<0.000000e+00> : vector<16x32xf32>
    %3 = tpu.matmul %1, %2, %cst {dimension_numbers = #tpu.dot_dimension_numbers<[1], [0], [0], [1], [0, 0, 1, 1], [], []>} : vector<16x16xbf16>, vector<16x32xbf16>, vector<16x32xf32> -> vector<16x32xf32>
    %c0_3 = arith.constant 0 : index
    %c0_4 = arith.constant 0 : index
    %4 = vector.load %arg3[%c0_3, %c0_4] : memref<1x32xf32, #tpu.memory_space<vmem>>, vector<1x32xf32>
    %5 = vector.broadcast %4 : vector<1x32xf32> to vector<16x32xf32>
    %6 = arith.addf %3, %5 : vector<16x32xf32>
    %c0_5 = arith.constant 0 : index
    %c0_6 = arith.constant 0 : index
    %7 = vector.load %arg4[%c0_5, %c0_6] : memref<16x32xf32, #tpu.memory_space<vmem>>, vector<16x32xf32>
    tpu.vector_store %arg4[%c0_5, %c0_6], %6 {strides = array<i32>} : memref<16x32xf32, #tpu.memory_space<vmem>>, vector<16x32xf32>,
    return
  }
  func.func @transform_0(%arg0: i32) -> (i32, i32) {
    %c0_i32 = arith.constant 0 : i32
    %c0_i32_0 = arith.constant 0 : i32
    return %arg0, %c0_i32 : i32, i32
  }
  func.func @transform_1(%arg0: i32) -> (i32, i32) {
    %c0_i32 = arith.constant 0 : i32
    %c0_i32_0 = arith.constant 0 : i32
    %c0_i32_1 = arith.constant 0 : i32
    return %c0_i32, %c0_i32_0 : i32, i32
  }
  func.func @transform_2(%arg0: i32) -> (i32, i32) {
    %c0_i32 = arith.constant 0 : i32
    %c0_i32_0 = arith.constant 0 : i32
    %c0_i32_1 = arith.constant 0 : i32
    return %c0_i32, %c0_i32_0 : i32, i32
  }
  func.func @transform_3(%arg0: i32) -> (i32, i32) {
    %c0_i32 = arith.constant 0 : i32
    %c0_i32_0 = arith.constant 0 : i32
    return %arg0, %c0_i32 : i32, i32
  }
}

</mosaic_0001>

<bundles_post_ra>
// kernel: tpu_custom_call.1
= control target key start
LH: loop header
LB: loop body
LE: loop exit
PB: predicated region body
PF: predicated region fallthrough
CT: control target
= control target key end

     0   :  { %8 = vsyncpa [#allocation3], 0  ;;  %s241_s0 = inlined_call_operand.hbm [shape: f32[16,16], index: 0, kind: input, shape index: {}]   ;;  %s242_s1 = inlined_call_operand.hbm [shape: bf16[16,32], index: 1, kind: input, shape index: {}]   ;;  %s243_s2 = inlined_call_operand.vmem [shape: f32[1,32], index: 2, kind: input, shape index: {}]   ;;  %s244_s3 = inlined_call_operand.hbm [shape: f32[16,32], index: 3, kind: output, shape index: {}]  }
   0x1   :  { %9 = vsyncpa [#allocation6], 0 }
   0x2   :  { %10 = vsyncpa [#allocation4], 0  ;;  %s15_s14 = sshll.u32 %s241_s0, 4  ;;  %s196_s15 = smov [#allocation2]   ;;  %s16_s14 = int_to_ptr.hbm [resolvable:$true] %s15_s14 }
   0x3   :  { %s17_s16 = sshll.u32 %s196_s15, 4  ;;  %s28_s19 = sshll.u32 %s242_s1, 4  ;;  %s18_s16 = int_to_ptr.vmem [resolvable:$true] %s17_s16  ;;  %s29_s19 = int_to_ptr.hbm [resolvable:$true] %s28_s19 }
   0x4   :  { %s197_s20 = smov 128   ;;  %s198_s21 = smov 8  }
   0x5   :  { %23 = dma.hbm_to_vmem [thread:$0]  %s16_s14, 256, %s18_s16, [#allocation3], %s197_s20, %s197_s20, %s198_s21  }
   0x6   :  { %s199_s22 = smov [#allocation5]   ;;  %s200_s24 = smov 64  }
   0x7   :  { %s30_s23 = sshll.u32 %s199_s22, 4  ;;  %s201_s0 = smov 4   ;;  %s31_s23 = int_to_ptr.vmem [resolvable:$true] %s30_s23 }
   0x8   :  { %36 = dma.hbm_to_vmem [thread:$0]  %s29_s19, 128, %s31_s23, [#allocation6], %s200_s24, %s200_s24, %s201_s0  }
   0x9   :  { %190 = dma.done.wait [#allocation3], 256  }
   0xa   :  { %191 = vsyncadd [#allocation3], 4294967040 }
   0xb   :  { %192 = dma.done.wait [#allocation6], 128  }
   0xc   :  { %193 = vsyncadd [#allocation6], 4294967168  ;;  %v109_v0 = vld [vmem:[#allocation5] sm:$0xff]  ;;  %v48_v1 = vld [vmem:[#allocation2] sm:$0xff]  ;;  %vm63_vm0 = vcmask 130048   ;;  %vm81_vm1 = vcmask 261120  }
   0xd   :  { %v49_v2 = vld [vmem:[#allocation2 + $0x8] sm:$0xff]  ;;  %74 = vmatpush.bf16.msra.mxu0 %v109_v0  ;;  %v117_v4 = vld [vmem:[%s243_s2] ss:$0 sm:$0xff]  ;;  %s202_s26 = smov [#allocation7]   ;;  %s90_s30 = sshll.u32 %s244_s3, 4  ;;  %s91_s30 = int_to_ptr.hbm [resolvable:$true] %s90_s30 }
   0xe   :  { %v50_v3 = vpack.c.bf16 %v49_v2, %v48_v1  ;;  %s88_s27 = sshll.u32 %s202_s26, 4  ;;  %s89_s27 = int_to_ptr.vmem [resolvable:$true] %s88_s27 }
  0x10   :  { %108 = vmatmul.msk.bf16.vlgmr.msra.gmra.mxu0 %vm63_vm0, %v50_v3 }
  0x8d   :  { %v76_v5 = vpop.f32.mrf.mxu0 }
  0x8e   :  { %v77_v6 = vadd.f32 %v117_v4, %v76_v5 }
  0x90   :  { %82 = vst.msk [vmem:[#allocation7] sm:$0xff] %vm81_vm1, %v77_v6 }
  0x95   :  { %v78_v7 = vpop.f32.mrf.mxu0 }
  0x96   :  { %v79_v8 = vadd.f32 %v117_v4, %v78_v7 }
  0x98   :  { %83 = vst.msk [vmem:[#allocation7 + $0x8] sm:$0xff] %vm81_vm1, %v79_v8 }
  0x99   :  { %96 = dma.vmem_to_hbm [thread:$0]  %s89_s27, 256, %s91_s30, [#allocation4], %s197_s20, %s197_s20, %s198_s21  }
  0x9a   :  { %194 = dma.done.wait [#allocation4], 256  }
  0x9b   :  { %195 = vsyncadd [#allocation4], 4294967040 }
  0x9c   :  { %101 = vsyncpa [#allocation3], 1 }
  0x9d   :  { %102 = vsyncpa [#allocation6], 1 }
  0x9e   :  { %103 = vsyncpa [#allocation4], 1 }

</bundles_post_ra>
